<compile_context>
chip_gen: v6e
topology: v6e:2x2x1
jax: 0.10.0
libtpu: 0.0.40
codegen_flags: <defaults>
</compile_context>

<pallas_src>
import math

import jax
import jax.numpy as jnp
import numpy as np
from jax.experimental import pallas as pl
from jax.experimental.pallas import tpu as pltpu


def token_embedding_kernel(x_ref, w_ref, o_ref, pad_ref):
    # x_ref:   (TB, L, C)     input tile (channels-last)
    # w_ref:   (3, C, D)      conv weight, tap order [prev, center, next]
    # o_ref:   (TB, L, D)     output tile (true d_model, no lane padding)
    # pad_ref: (TB, L+2, C)   VMEM scratch: circularly padded input rows
    TB, L, C = x_ref.shape
    D = o_ref.shape[-1]

    x = x_ref[...]  # one aligned full-tile load

    # pad rows: [x[L-1], x[0], ..., x[L-1], x[0]]  (circular pad of width 1).
    pad_ref[:, 1:L + 1, :] = x
    pad_ref[:, 0:1, :] = x[:, L - 1:L, :]
    pad_ref[:, L + 1:L + 2, :] = x[:, 0:1, :]

    x_ctr = x.reshape(TB * L, C)
    x_prev = pad_ref[:, 0:L, :].reshape(TB * L, C)        # x[(l-1) % L]
    x_next = pad_ref[:, 2:L + 2, :].reshape(TB * L, C)    # x[(l+1) % L]

    # Three 2-D MXU matmuls, f32 accumulation.
    acc = jnp.dot(x_ctr, w_ref[1], preferred_element_type=jnp.float32)
    acc = acc + jnp.dot(x_prev, w_ref[0], preferred_element_type=jnp.float32)
    acc = acc + jnp.dot(x_next, w_ref[2], preferred_element_type=jnp.float32)

    o_ref[...] = acc.reshape(TB, L, D).astype(o_ref.dtype)


def _round_up(v, m):
    return ((v + m - 1) // m) * m


def _padded_bytes(shape, itemsize):
    """Bytes a buffer occupies in VMEM: last dim padded to 128 lanes, second-to-last
    padded to the dtype's sublane tile (8 rows f32, 16 bf16, 32 int8)."""
    sublane = 8 * (4 // itemsize)
    *lead, rows, cols = shape
    n = 1
    for d in lead:
        n *= d
    return n * _round_up(rows, sublane) * _round_up(cols, 128) * itemsize


def _choose_batch_tile(B, L, C, D, in_dtype, out_dtype,
                       max_rows=1024, vmem_budget_bytes=20 * (1 << 20)):
    """Pick TB (batches per grid step): biggest tile under a layout-padding-aware
    VMEM budget, capped at ~1024 matmul rows, then reduced so the grid has
    >= 4 steps when B allows (2 per v7x TensorCore keeps the BlockSpec
    double-buffer overlapping DMA with compute) or >= 2 steps for B == 2..3."""
    in_b = jnp.dtype(in_dtype).itemsize
    out_b = jnp.dtype(out_dtype).itemsize
    tb = max(1, min(B, max_rows // max(L, 1)))

    def est(t):
        x_b = 2 * _padded_bytes((t, L, C), in_b)        # input block, double-buffered
        o_b = 2 * _padded_bytes((t, L, D), out_b)       # output block, double-buffered
        pad_b = _padded_bytes((t, L + 2, C), in_b)      # circular-pad scratch
        w_b = 2 * _padded_bytes((3, C, D), in_b)        # resident weight (dbl-buffered)
        acc_b = _padded_bytes((t * L, D), 4)            # live f32 accumulator
        return x_b + o_b + pad_b + w_b + acc_b

    while tb > 1 and est(tb) > vmem_budget_bytes:
        tb -= 1
    if B >= 4:
        tb = min(tb, max(1, B // 4))
    elif B >= 2:
        tb = min(tb, max(1, B // 2))
    return tb


def token_embedding(x, weight, out_dtype=None):
    """x: (B, L, c_in, c_in); weight: (d_model, c_in**2, 3) [torch Conv1d layout].

    Returns (B, L, d_model), matching TokenEmbedding.forward.  Operands run in
    x.dtype (pass bf16 x / out_dtype for the mem-bound win); accumulation is f32.
    """
    B, L, ci1, ci2 = x.shape
    C = ci1 * ci2
    D = weight.shape[0]
    assert weight.shape == (D, C, 3)
    out_dtype = x.dtype if out_dtype is None else jnp.dtype(out_dtype)

    # permute(0,2,3,1).reshape(B,C,L) read channels-last is exactly x.reshape(B,L,C).
    x_flat = x.reshape(B, L, C)

    # Pack weight tap-major: w[k, c, d] = weight[d, c, k];  k = 0/1/2 = prev/center/next.
    w = jnp.asarray(weight).transpose(2, 1, 0).astype(x.dtype)  # (3, C, D)

    TB = _choose_batch_tile(B, L, C, D, x.dtype, out_dtype)
    grid = (pl.cdiv(B, TB),)

    return pl.pallas_call(
        token_embedding_kernel,
        out_shape=jax.ShapeDtypeStruct((B, L, D), out_dtype),
        grid=grid,
        in_specs=[
            pl.BlockSpec((TB, L, C), lambda b: (b, 0, 0)),
            pl.BlockSpec((3, C, D), lambda b: (0, 0, 0)),   # constant -> stays resident
        ],
        out_specs=pl.BlockSpec((TB, L, D), lambda b: (b, 0, 0)),
        scratch_shapes=[pltpu.VMEM((TB, L + 2, C), x.dtype)],
        compiler_params=pltpu.CompilerParams(
            dimension_semantics=("parallel",),
            vmem_limit_bytes=32 * 1024 * 1024),
    )(x_flat, w)


def reference(x, weight):
    """NumPy reference of the circular conv1d forward (for validation)."""
    xf = np.asarray(x, dtype=np.float64)
    wt = np.asarray(weight, dtype=np.float64).transpose(2, 1, 0)  # (3, C, D)
    B, L, ci1, ci2 = xf.shape
    C = ci1 * ci2
    xf = xf.reshape(B, L, C)
    x_prev = np.roll(xf, 1, axis=1)
    x_next = np.roll(xf, -1, axis=1)
    return x_prev @ wt[0] + xf @ wt[1] + x_next @ wt[2]


if __name__ == "__main__":
    # Small shapes consistent with the module: batch=2, c_in=4 (=> C=16),
    # seq=8, d_model=32.
    B, L, c_in, d_model = 2, 8, 4, 32
    C = c_in * c_in

    key = jax.random.PRNGKey(0)
    kx, kw = jax.random.split(key)
    x = jax.random.normal(kx, (B, L, c_in, c_in), dtype=jnp.float32)

    # Deterministic kaiming_normal_(mode='fan_in', nonlinearity='leaky_relu'):
    # fan_in = C * kernel_size, gain = sqrt(2 / (1 + 0.01**2)).
    fan_in = C * 3
    gain = math.sqrt(2.0 / (1.0 + 0.01 ** 2))
    std = gain / math.sqrt(fan_in)
    weight = std * jax.random.normal(kw, (d_model, C, 3), dtype=jnp.float32)

    y = jax.block_until_ready(token_embedding(x, weight))
    y_ref = reference(x, weight)

    assert y.shape == (B, L, d_model)
    # Tolerance accommodates MXU matmul precision while still catching any
    # tap-order / layout bug (those produce O(1) errors).
    assert np.allclose(np.asarray(y, dtype=np.float64), y_ref, atol=3e-2, rtol=3e-2)

    print("KERNEL_OK")
</pallas_src>

<mosaic_0001>
module attributes {stable_mosaic.version = 11 : i64} {
  func.func @token_embedding_kernel(%arg0: i32, %arg1: memref<1x8x16xf32, #tpu.memory_space<vmem>>, %arg2: memref<3x16x32xf32, #tpu.memory_space<vmem>>, %arg3: memref<1x8x32xf32, #tpu.memory_space<vmem>>, %arg4: memref<1x10x16xf32, #tpu.memory_space<vmem>>) attributes {dimension_semantics = [#tpu.dimension_semantics<parallel>], iteration_bounds = array<i64: 2>, scalar_prefetch = 0 : i64, scratch_operands = 1 : i64, tpu.core_type = #tpu.core_type<tc>, window_params = [{transform_indices = @transform_0, window_bounds = array<i64: 1, 8, 16>}, {pipeline_mode = #tpu.pipeline_mode<synchronous>, transform_indices = @transform_1, window_bounds = array<i64: 3, 16, 32>}, {transform_indices = @transform_2, window_bounds = array<i64: 1, 8, 32>}]} {
    %c0 = arith.constant 0 : index
    %c0_0 = arith.constant 0 : index
    %c0_1 = arith.constant 0 : index
    %0 = vector.load %arg1[%c0, %c0_0, %c0_1] : memref<1x8x16xf32, #tpu.memory_space<vmem>>, vector<1x8x16xf32>
    %c0_2 = arith.constant 0 : index
    %c1 = arith.constant 1 : index
    %c0_3 = arith.constant 0 : index
    %1 = vector.load %arg4[%c0_2, %c1, %c0_3] : memref<1x10x16xf32, #tpu.memory_space<vmem>>, vector<1x8x16xf32>
    tpu.vector_store %arg4[%c0_2, %c1, %c0_3], %0 {strides = array<i32>} : memref<1x10x16xf32, #tpu.memory_space<vmem>>, vector<1x8x16xf32>,
    %2 = vector.extract_strided_slice %0 {offsets = [0, 7, 0], sizes = [1, 1, 16], strides = [1, 1, 1]} : vector<1x8x16xf32> to vector<1x1x16xf32>
    %c0_4 = arith.constant 0 : index
    %c0_5 = arith.constant 0 : index
    %c0_6 = arith.constant 0 : index
    %3 = vector.load %arg4[%c0_4, %c0_5, %c0_6] : memref<1x10x16xf32, #tpu.memory_space<vmem>>, vector<1x1x16xf32>
    tpu.vector_store %arg4[%c0_4, %c0_5, %c0_6], %2 {strides = array<i32>} : memref<1x10x16xf32, #tpu.memory_space<vmem>>, vector<1x1x16xf32>,
    %4 = vector.extract_strided_slice %0 {offsets = [0, 0, 0], sizes = [1, 1, 16], strides = [1, 1, 1]} : vector<1x8x16xf32> to vector<1x1x16xf32>
    %c0_7 = arith.constant 0 : index
    %c9 = arith.constant 9 : index
    %c0_8 = arith.constant 0 : index
    %5 = vector.load %arg4[%c0_7, %c9, %c0_8] : memref<1x10x16xf32, #tpu.memory_space<vmem>>, vector<1x1x16xf32>
    tpu.vector_store %arg4[%c0_7, %c9, %c0_8], %4 {strides = array<i32>} : memref<1x10x16xf32, #tpu.memory_space<vmem>>, vector<1x1x16xf32>,
    %6 = vector.shape_cast %0 : vector<1x8x16xf32> to vector<8x16xf32>
    %c0_9 = arith.constant 0 : index
    %c0_10 = arith.constant 0 : index
    %c0_11 = arith.constant 0 : index
    %7 = vector.load %arg4[%c0_9, %c0_10, %c0_11] : memref<1x10x16xf32, #tpu.memory_space<vmem>>, vector<1x8x16xf32>
    %8 = vector.shape_cast %7 : vector<1x8x16xf32> to vector<8x16xf32>
    %c0_12 = arith.constant 0 : index
    %c2 = arith.constant 2 : index
    %c0_13 = arith.constant 0 : index
    %9 = vector.load %arg4[%c0_12, %c2, %c0_13] : memref<1x10x16xf32, #tpu.memory_space<vmem>>, vector<1x8x16xf32>
    %10 = vector.shape_cast %9 : vector<1x8x16xf32> to vector<8x16xf32>
    %c1_14 = arith.constant 1 : index
    %c0_15 = arith.constant 0 : index
    %c0_16 = arith.constant 0 : index
    %11 = vector.load %arg2[%c1_14, %c0_15, %c0_16] : memref<3x16x32xf32, #tpu.memory_space<vmem>>, vector<1x16x32xf32>
    %12 = vector.shape_cast %11 : vector<1x16x32xf32> to vector<16x32xf32>
    %cst = arith.constant dense<0.000000e+00> : vector<8x32xf32>
    %13 = tpu.matmul %6, %12, %cst {dimension_numbers = #tpu.dot_dimension_numbers<[1], [0], [0], [1], [0, 0, 1, 1], [], []>} : vector<8x16xf32>, vector<16x32xf32>, vector<8x32xf32> -> vector<8x32xf32>
    %c0_17 = arith.constant 0 : index
    %c0_18 = arith.constant 0 : index
    %c0_19 = arith.constant 0 : index
    %14 = vector.load %arg2[%c0_17, %c0_18, %c0_19] : memref<3x16x32xf32, #tpu.memory_space<vmem>>, vector<1x16x32xf32>
    %15 = vector.shape_cast %14 : vector<1x16x32xf32> to vector<16x32xf32>
    %cst_20 = arith.constant dense<0.000000e+00> : vector<8x32xf32>
    %16 = tpu.matmul %8, %15, %cst_20 {dimension_numbers = #tpu.dot_dimension_numbers<[1], [0], [0], [1], [0, 0, 1, 1], [], []>} : vector<8x16xf32>, vector<16x32xf32>, vector<8x32xf32> -> vector<8x32xf32>
    %17 = arith.addf %13, %16 : vector<8x32xf32>
    %c2_21 = arith.constant 2 : index
    %c0_22 = arith.constant 0 : index
    %c0_23 = arith.constant 0 : index
    %18 = vector.load %arg2[%c2_21, %c0_22, %c0_23] : memref<3x16x32xf32, #tpu.memory_space<vmem>>, vector<1x16x32xf32>
    %19 = vector.shape_cast %18 : vector<1x16x32xf32> to vector<16x32xf32>
    %cst_24 = arith.constant dense<0.000000e+00> : vector<8x32xf32>
    %20 = tpu.matmul %10, %19, %cst_24 {dimension_numbers = #tpu.dot_dimension_numbers<[1], [0], [0], [1], [0, 0, 1, 1], [], []>} : vector<8x16xf32>, vector<16x32xf32>, vector<8x32xf32> -> vector<8x32xf32>
    %21 = arith.addf %17, %20 : vector<8x32xf32>
    %22 = vector.shape_cast %21 : vector<8x32xf32> to vector<1x8x32xf32>
    %c0_25 = arith.constant 0 : index
    %c0_26 = arith.constant 0 : index
    %c0_27 = arith.constant 0 : index
    %23 = vector.load %arg3[%c0_25, %c0_26, %c0_27] : memref<1x8x32xf32, #tpu.memory_space<vmem>>, vector<1x8x32xf32>
    tpu.vector_store %arg3[%c0_25, %c0_26, %c0_27], %22 {strides = array<i32>} : memref<1x8x32xf32, #tpu.memory_space<vmem>>, vector<1x8x32xf32>,
    return
  }
  func.func @transform_0(%arg0: i32) -> (i32, i32, i32) {
    %c0_i32 = arith.constant 0 : i32
    %c0_i32_0 = arith.constant 0 : i32
    %c0_i32_1 = arith.constant 0 : i32
    return %arg0, %c0_i32, %c0_i32_0 : i32, i32, i32
  }
  func.func @transform_1(%arg0: i32) -> (i32, i32, i32) {
    %c0_i32 = arith.constant 0 : i32
    %c0_i32_0 = arith.constant 0 : i32
    %c0_i32_1 = arith.constant 0 : i32
    %c0_i32_2 = arith.constant 0 : i32
    return %c0_i32, %c0_i32_0, %c0_i32_1 : i32, i32, i32
  }
  func.func @transform_2(%arg0: i32) -> (i32, i32, i32) {
    %c0_i32 = arith.constant 0 : i32
    %c0_i32_0 = arith.constant 0 : i32
    %c0_i32_1 = arith.constant 0 : i32
    return %arg0, %c0_i32, %c0_i32_0 : i32, i32, i32
  }
}

</mosaic_0001>

<bundles_post_ra>
// kernel: tpu_custom_call.1
= control target key start
LH: loop header
LB: loop body
LE: loop exit
PB: predicated region body
PF: predicated region fallthrough
CT: control target
= control target key end

     0   :  { %7 = vsyncpa [#allocation4], 0  ;;  %s932_s0 = inlined_call_operand.hbm [shape: f32[2,8,16], index: 0, kind: input, shape index: {}]   ;;  %s933_s1 = inlined_call_operand.hbm [shape: f32[3,16,32], index: 1, kind: input, shape index: {}]   ;;  %s934_s2 = inlined_call_operand.hbm [shape: f32[2,8,32], index: 2, kind: output, shape index: {}]  }
   0x1   :  { %9 = vsyncpa [#allocation4 + $0x1], 0 }
   0x2   :  { %10 = vsyncpa [#allocation7], 0 }
   0x3   :  { %11 = vsyncpa [#allocation5], 0 }
   0x4   :  { %13 = vsyncpa [#allocation5 + $0x1], 0  ;;  %s761_s9 = smov 0   ;;  %s763_s10 = smov 0  }
   0x5   :  { %s765_s11 = smov 0   ;;  %s767_s12 = smov 0  }
   0x6 LB: > { %s782_s13 = sadd.s32 4294967295, %s737_s12   ;;  %s507_s14 = sadd.s32 4294967294, %s737_s12   ;;  %s737_s12 = sphi %s767_s12, %s956_s12   ;;  %s733_s11 = sphi %s765_s11, %s955_s11   ;;  %s729_s10 = sphi %s763_s10, %s954_s10   ;;  %s725_s9 = sphi %s761_s9, %s953_s9  }
   0x7   : > { %p39_p0 = scmp.ne.s32.totalorder %s729_s10, %s725_s9  ;;  %p935_p1 = scmp.eq.s32.totalorder %s782_s13, 0 }
   0x8   : > { %p90_p3 = scmp.eq.s32.totalorder %s507_s14, 1  ;;  %p508_p5 = scmp.ge.s32.totalorder %s737_s12, 1 }
   0x9   : > { %p791_p4 = por %p935_p1, %p39_p0  ;;  %p97_p7 = scmp.lt.s32.totalorder %s737_s12, 3 }
   0xa   : > { %p796_p6 = por %p90_p3, %p39_p0  ;;  %s739_s18 = smov [#allocation6]  }
   0xb   : > { %s939_s15 = scalar_select %p791_p4, 1, 0 }
   0xc   : > { %s940_s16 = scalar_select %p796_p6, 1, 0 }
   0xd   : > { %p801_p8 = pnand %p508_p5, %p97_p7  ;;  %s109_s19 = sshll.u32 %s739_s18, 4  ;;  %s110_s19 = int_to_ptr.vmem [resolvable:$true] %s109_s19 }
   0xe   : > { %s815_s21 = sadd.s32 1, %s737_s12   ;;  %s26_s22 = sadd.s32 1, %s733_s11 }
   0xf   : > { %s941_s17 = scalar_select %p801_p8, 1, 0 }
  0x10   : > { %p562_p9 = pneg %p801_p8  ;;  %s23_s23 = ssub.s32 %s737_s12, %s815_s21 }
  0x11   : > { %s626_s24 = scalar_lea.vmem %s110_s19, 768  ;;  %p634_p5 = scmp.lt.s32.totalorder %s110_s19, %s110_s19 }
  0x12   : > { %p810_p11 = pnand %p562_p9, %p935_p1  ;;  %p627_p13 = scmp.ne.s32.totalorder %s110_s19, %s626_s24 }
  0x13   : > { %p635_p7 = scmp.lt.s32.totalorder %s626_s24, %s626_s24 }
  0x14   : > { %p617_p12 = pneg %p810_p11 }
  0x15   : > { %p636_p10 = por %p635_p7, %p634_p5 }
  0x16   : > { %p629_p0 = pnand %p627_p13, %p617_p12 }
  0x18   : > { %p630_p3 = pneg %p629_p0 }
  0x1a   : > { %p637_p2 = pnand %p636_p10, %p630_p3 }
  0x1c   : > { %640 = shalt.err (!%p637_p2)
}
  0x1d   : > { %s740_s25 = smov 128   ;;  %s741_s26 = smov 8  }
  0x1e   : > { %565 = dma.hbm_to_vmem [thread:$0]  (!%p810_p11), %s933_s1, 768, %s110_s19, [#allocation7], %s740_s25, %s740_s25, %s741_s26  }
  0x1f   : > { %p24_p9 = scmp.eq.s32.totalorder %s23_s23, 0  ;;  %p33_p12 = scmp.ne.s32.totalorder %s733_s11, %s729_s10 }
  0x20   : > { %p34_p10 = scmp.eq.s32.totalorder %s737_s12, 0  ;;  %p575_p2 = scmp.lt.s32.totalorder %s737_s12, 2 }
  0x21   : > { %s832_s29 = scalar_select %p24_p9, %s733_s11, %s26_s22  }
  0x22   : > { %p35_p13 = por %p34_p10, %p33_p12  ;;  %p943_p0 = scmp.eq.s32.totalorder %s782_s13, 1 }
  0x23   : > { %s123_s3 = sand.u32 1, %s733_s11   ;;  %s512_s4 = sshll.u32 %s737_s12, 7 }
  0x24   : > { %p836_p3 = por %p943_p0, %p33_p12  ;;  %s511_s5 = sshll.u32 %s123_s3, 3 }
  0x25   : > { %s845_s8 = scalar_lea.hbm %s932_s0, %s512_s4  ;;  %s127_s14 = scalar_lea.vmem [#allocation3], %s511_s5 }
  0x26   : > { %s944_s30 = scalar_select %p836_p3, 1, 0 }
  0x27   : > { %s134_s18 = sshll.u32 %s127_s14, 4  ;;  %p847_p11 = pnand %p575_p2, %p35_p13  ;;  %s135_s18 = int_to_ptr.vmem [resolvable:$true] %s134_s18 }
  0x28   : > { %s124_s20 = scalar_lea.sflag [#allocation4], %s123_s3  ;;  %s641_s22 = scalar_lea.hbm %s845_s8, 128 }
  0x29   : > { %p642_p5 = scmp.ne.s32.totalorder %s845_s8, %s641_s22  ;;  %p643_p7 = pneg %p847_p11 }
  0x2a   : > { %s646_s25 = scalar_lea.hbm %s932_s0, 256  ;;  %p647_p10 = scmp.lt.s32.totalorder %s845_s8, %s932_s0 }
  0x2b   : > { %p644_p9 = pnand %p643_p7, %p642_p5  ;;  %p648_p2 = scmp.lt.s32.totalorder %s646_s25, %s641_s22 }
  0x2d   : > { %p645_p12 = pneg %p644_p9  ;;  %p649_p13 = por %p648_p2, %p647_p10 }
  0x2f   : > { %p650_p0 = pnand %p649_p13, %p645_p12 }
  0x31   : > { %653 = shalt.err (!%p650_p0)
}
  0x32   : > { %s654_s28 = scalar_lea.vmem %s135_s18, 128  ;;  %s742_s3 = smov [#allocation3]  }
  0x33   : > { %p655_p1 = scmp.ne.s32.totalorder %s135_s18, %s654_s28  ;;  %s659_s4 = sshll.u32 %s742_s3, 4  ;;  %s660_s4 = int_to_ptr.vmem [resolvable:$false] %s659_s4 }
  0x34   : > { %s661_s5 = scalar_lea.vmem %s660_s4, 256  ;;  %p662_p5 = scmp.lt.s32.totalorder %s135_s18, %s660_s4 }
  0x35   : > { %p657_p6 = pnand %p655_p1, %p643_p7  ;;  %p663_p9 = scmp.lt.s32.totalorder %s661_s5, %s654_s28 }
  0x37   : > { %p658_p3 = pneg %p657_p6  ;;  %p664_p4 = por %p663_p9, %p662_p5 }
  0x39   : > { %p665_p8 = pnand %p664_p4, %p658_p3 }
  0x3b   : > { %668 = shalt.err (!%p665_p8)
}
  0x3c   : > { %569 = dma.hbm_to_vmem [thread:$0]  (!%p847_p11), %s845_s8, 128, %s135_s18, %s124_s20  }
  0x3d   : > { %p946_p12 = scmp.ne.s32.totalorder %s941_s17, 0 }
  0x3e   : > { %s868_s6 = sand.u32 (!%p946_p12), 1, %s729_s10   ;;  %p947_p1 = scmp.ne.s32.totalorder (!%p946_p12), %s939_s15, 0 }
  0x3f   : > { %143 = sbr.rel (%p946_p12) target bundleno = 296 (0x128), region = 28  ;;  %s514_s7 = sshll.u32 (!%p946_p12), %s868_s6, 3 }
  0x40   : > { %s146_s14 = scalar_lea.sflag (!%p946_p12), [#allocation4], %s868_s6  ;;  %s149_s22 = scalar_lea.vmem (!%p946_p12), [#allocation3], %s514_s7 }
  0x44   : > { %712 = dma.done.wait (%p947_p1), %s146_s14, 128  }
  0x45   : > { %714 = vsyncadd (%p947_p1), %s146_s14, 4294967168  ;;  %p948_p4 = scmp.eq.s32.totalorder %s782_s13, 0 }
  0x47   : > { %716 = dma.done.wait (%p948_p4), [#allocation7], 768   ;;  %p949_p6 = pmov %p948_p4 }
  0x48   : > { %v743_v0 = vmov 0.0   ;;  %vm744_vm0 = vmmov 0   ;;  %vm175_vm1 = vcmask 130048   ;;  %vm177_vm2 = vcmask 130055   ;;  %v187_v1 = vld [vmem:[#allocation6 + $0x8] sm:$0xff]  ;;  %v185_v2 = vld [vmem:[#allocation6 + $0x18] sm:$0xff] }
  0x49   : > { %718 = vsyncadd (%p949_p6), [#allocation7], 4294966528  ;;  %533 = vmatprep.subr.mxu0 %v743_v0  ;;  %540 = vmatprep.subr.mxu1 %v743_v0  ;;  %vm179_vm3 = vcmask 122880   ;;  %v186_v3 = vld [vmem:[#allocation6] sm:$0xff]  ;;  %v184_v4 = vld [vmem:[#allocation6 + $0x10] sm:$0xff]  ;;  %s521_s15 = sshll.u32 %s782_s13, 7 }
  0x4a   : > { %537 = vmatprep.mubr.msk.f32.mxu0 %vm744_vm0, %v743_v0  ;;  %544 = vmatprep.mubr.msk.f32.mxu1 %vm744_vm0, %v743_v0  ;;  %v174_v5 = vld [vmem:[%s149_s22] sm:$0xff]  ;;  %v336_v6 = vld [vmem:[#allocation6 + $0x28] sm:$0xff]  ;;  %v335_v8 = vld [vmem:[#allocation6 + $0x20] sm:$0xff]  ;;  %s173_s17 = scalar_lea.vmem [#allocation8], %s514_s7  ;;  %vm411_vm4 = vcmask 261120   ;;  %s895_s20 = scalar_lea.hbm %s934_s2, %s521_s15 }
  0x4b   : > { %534 = vmatpush3.msra.mxu0 %v187_v1  ;;  %541 = vmatpush3.msra.mxu1 %v185_v2  ;;  %176 = vst.msk [vmem:[#allocation2 + $0x1] sm:$0xff] %vm175_vm1, %v174_v5  ;;  %s427_s8 = sshll.u32 %s173_s17, 4  ;;  %s414_s23 = scalar_lea.sflag [#allocation5], %s868_s6  ;;  %s428_s8 = int_to_ptr.vmem [resolvable:$true] %s427_s8 }
  0x4c   : > { %535 = vmatprep.subr.mxu0 %v743_v0  ;;  %542 = vmatprep.subr.mxu1 %v743_v0  ;;  %178 = vst.msk [vmem:[#allocation2 - $0x7] sm:$0x80] %vm177_vm2, %v174_v5  ;;  %s669_s24 = scalar_lea.vmem %s428_s8, 128  ;;  %p950_p3 = scmp.ne.s32.totalorder %s944_s30, 0 }
  0x4d   : > { %180 = vst.msk [vmem:[#allocation2 + $0x9] sm:$0x1] %vm179_vm3, %v174_v5  ;;  %536 = vmatpush3.msra.mxu0 %v186_v3  ;;  %543 = vmatpush3.msra.mxu1 %v184_v4  ;;  %p670_p8 = scmp.ne.s32.totalorder %s428_s8, %s669_s24  ;;  %s745_s13 = smov [#allocation8]  }
  0x4e   : > { %547 = vmatprep.subr.mxu0 %v743_v0  ;;  %545 = vmatmul.mubr.msk.f32.vlgmr.msra.gmra.mxu1 %vm175_vm1, %v174_v5  ;;  %s673_s25 = sshll.u32 %s745_s13, 4  ;;  %s674_s25 = int_to_ptr.vmem [resolvable:$false] %s673_s25 }
  0x4f   : > { %p671_p11 = pnand %p670_p8, %p950_p3  ;;  %s675_s26 = scalar_lea.vmem %s674_s25, 256 }
  0x50   : > { %p676_p10 = scmp.lt.s32.totalorder %s428_s8, %s674_s25  ;;  %p677_p2 = scmp.lt.s32.totalorder %s675_s26, %s669_s24 }
  0x51   : > { %p672_p7 = pneg %p671_p11 }
  0x52   : > { %p678_p13 = por %p677_p2, %p676_p10 }
  0x53   : > { %v181_v7 = vld [vmem:[#allocation2] sm:$0xff] }
  0x54   : > { %538 = vmatmul.mubr.msk.f32.vlgmr.msra.gmra.mxu0 %vm175_vm1, %v181_v7  ;;  %v182_v9 = vld [vmem:[#allocation2 + $0x2] sm:$0xff]  ;;  %p679_p0 = pnand %p678_p13, %p672_p7 }
  0x55   : > { %548 = vmatpush3.msra.mxu0 %v336_v6  ;;  %551 = vmatprep.mubr.msk.f32.mxu0 %vm744_vm0, %v743_v0 }
  0x56   : > { %549 = vmatprep.subr.mxu0 %v743_v0 }
  0x57   : > { %550 = vmatpush3.msra.mxu0 %v335_v8 }
  0x58   : > { %552 = vmatmul.mubr.msk.f32.vlgmr.msra.gmra.mxu0 %vm175_vm1, %v182_v9 }
 0x10e   : > { %v330_v10 = vpop.f32.mrf.mxu1 }
 0x110   : > { %v546_v11 = vpop.f32.mrf.mxu1 }
 0x114   : > { %v257_v12 = vpop.f32.mrf.mxu0 }
 0x115   : > { %v331_v14 = vadd.f32 %v330_v10, %v257_v12 }
 0x116   : > { %v539_v13 = vpop.f32.mrf.mxu0 }
 0x118   : > { %v406_v15 = vpop.f32.mrf.mxu0 }
 0x119   : > { %v410_v16 = vadd.f32 %v406_v15, %v331_v14 }
 0x11a   : > { %v553_v17 = vpop.f32.mrf.mxu0 }
 0x11b   : > { %412 = vst.msk [vmem:[%s173_s17] sm:$0xff] %vm411_vm4, %v410_v16 }
 0x11c   : > { %682 = shalt.err (!%p679_p0)
}
 0x11d   : > { %s683_s27 = scalar_lea.hbm %s895_s20, 128  ;;  %s687_s4 = scalar_lea.hbm %s934_s2, 256 }
 0x11e   : > { %p684_p5 = scmp.ne.s32.totalorder %s895_s20, %s683_s27  ;;  %p688_p1 = scmp.lt.s32.totalorder %s895_s20, %s934_s2 }
 0x11f   : > { %p689_p4 = scmp.lt.s32.totalorder %s687_s4, %s683_s27 }
 0x120   : > { %p685_p9 = pnand %p684_p5, %p950_p3 }
 0x121   : > { %p690_p6 = por %p689_p4, %p688_p1 }
 0x122   : > { %p686_p12 = pneg %p685_p9 }
 0x124   : > { %p691_p8 = pnand %p690_p6, %p686_p12 }
 0x126   : > { %694 = shalt.err (!%p691_p8)
}
 0x127   : > { %560 = dma.vmem_to_hbm [thread:$0]  (%p950_p3), %s428_s8, 128, %s895_s20, %s414_s23  }
 0x128 PF: > { %s439_s7 = sand.u32 1, %s725_s9   ;;  %p951_p11 = scmp.ne.s32.totalorder %s940_s16, 0 }
 0x129   : > { %p952_p7 = scmp.ge.s32.totalorder %s737_s12, 2  ;;  %s440_s14 = scalar_lea.sflag [#allocation5], %s439_s7 }
 0x12b   : > { %p571_p10 = pnand %p952_p7, %p951_p11 }
 0x12d   : > { %p572_p2 = pneg %p571_p10 }
 0x12f   : > { %720 = dma.done.wait (%p572_p2), %s440_s14, 128  }
 0x130   : > { %722 = vsyncadd (%p572_p2), %s440_s14, 4294967168  ;;  %p16_p13 = scmp.ge.s32.totalorder %s815_s21, 4   ;;  %s953_s9 = smov %s729_s10 }
 0x131   : > { %s954_s10 = smov %s733_s11  ;;  %s955_s11 = smov %s832_s29 }
 0x132   : > { %s956_s12 = smov %s815_s21  ;;  %18 = sbr.rel (!%p16_p13) target bundleno = 6 (0x6), region = 79 }
 0x137   :  { %445 = vsyncpa [#allocation4], 1 }
 0x138   :  { %447 = vsyncpa [#allocation4 + $0x1], 1 }
 0x139   :  { %448 = vsyncpa [#allocation7], 1 }
 0x13a   :  { %449 = vsyncpa [#allocation5], 1 }
 0x13b   :  { %451 = vsyncpa [#allocation5 + $0x1], 1 }

</bundles_post_ra>
